<compile_context>
chip_gen: v7x
topology: tpu7x:2x2x1
jax: 0.10.0
libtpu: 0.0.40
codegen_flags: <defaults>
</compile_context>

<pallas_src>
import functools

import jax
import jax.numpy as jnp
from jax.experimental import pallas as pl
from jax.experimental.pallas import tpu as pltpu

LANE = 128          # vreg lane width; pad hidden/output feature dims to this
SUBLANE = 16        # bf16 packs 16 rows/vreg; round batch tiles to this
NEG_INF = -1e30     # bias value for padded output lanes (vanishes under softmax)


def _ceil_to(x, m):
    return -(-x // m) * m


def policy_mlp_kernel(x_ref, *refs):
    """Fused padded MLP + softmax for one batch tile.

    x_ref : [TB, in]  bf16
    refs  : (w1, b1, w2, b2, ..., wN, bN, o_ref)
            w*: bf16, hidden/output dims padded to 128 lanes (pad = 0)
            b*: f32 [1, 128]; the LAST bias carries NEG_INF in padded lanes
    o_ref : [TB, 128] bf16 padded probabilities (padded lanes == 0)
    """
    o_ref = refs[-1]
    wb = refs[:-1]
    n_layers = len(wb) // 2

    h = x_ref[...]                                      # already bf16
    logits = None
    for li in range(n_layers):
        w = wb[2 * li][...]
        b = wb[2 * li + 1][...]
        z = jnp.dot(h, w, preferred_element_type=jnp.float32) + b
        if li + 1 < n_layers:
            # Linear -> ReLU (-> Dropout == identity at inference)
            h = jnp.maximum(z, 0.0).astype(jnp.bfloat16)
        else:
            logits = z                                  # padded lanes ~ -1e30

    # Numerically stable softmax over the (padded) last dim.
    m = jnp.max(logits, axis=-1, keepdims=True)
    e = jnp.exp(logits - m)                             # padded lanes -> 0
    denom = jnp.sum(e, axis=-1, keepdims=True)
    # Exact divide so rows sum to 1 (approx reciprocal was ~1e-3 off).
    o_ref[...] = (e / denom).astype(o_ref.dtype)


def _pad_params_for_kernel(params, n_layers):
    """Zero-pad hidden/output dims to 128 lanes; weights -> bf16, biases -> f32.

    Zero-padded weight rows/cols and zero bias padding are numerically inert
    through Linear+ReLU; the final bias padding is NEG_INF so padded logits
    vanish under softmax. The TRUE input dim of layer 1 is left unpadded.
    """
    flat = []
    for li in range(1, n_layers + 1):
        w = params[f"w{li}"]
        b = params[f"b{li}"]
        fi, fo = w.shape
        fi_p = fi if li == 1 else max(fi, LANE)     # only pad (padded) hidden dims
        fo_p = max(fo, LANE)
        w_p = (jnp.zeros((fi_p, fo_p), jnp.float32)
               .at[:fi, :fo].set(w)).astype(jnp.bfloat16)
        fill = NEG_INF if li == n_layers else 0.0
        b_p = jnp.full((1, fo_p), fill, jnp.float32).at[:, :fo].set(b)
        flat.extend([w_p, b_p])
    return tuple(flat)


def _choose_batch_tile(B, block_rows):
    """Pick (tile_rows, padded_batch).

    - multiples of 16 rows (clean bf16 sublane packing),
    - >= 2 grid steps whenever the batch allows it (v7x dual-TC sharding),
    - tiles as large as possible (<= block_rows) to amortize ~0.35us/step.
    """
    b16 = _ceil_to(B, SUBLANE)
    if b16 <= SUBLANE:
        return SUBLANE, SUBLANE
    n_steps = max(2, -(-b16 // block_rows))
    tb = _ceil_to(-(-b16 // n_steps), SUBLANE)
    return tb, n_steps * tb


@functools.partial(jax.jit, static_argnames=("batch", "out_size", "block_rows"))
def _policy_forward_padded(x_pad, flat_params, *, batch, out_size, block_rows):
    b_pad, in_size = x_pad.shape
    grid = (pl.cdiv(b_pad, block_rows),)

    def full(a):
        return pl.BlockSpec(a.shape, lambda i: (0,) * a.ndim)

    in_specs = [pl.BlockSpec((block_rows, in_size), lambda i: (i, 0))]   # x tile
    in_specs += [full(p) for p in flat_params]                           # resident

    out_pad = pl.pallas_call(
        policy_mlp_kernel,
        out_shape=jax.ShapeDtypeStruct((b_pad, LANE), jnp.bfloat16),     # bf16 out
        grid=grid,
        in_specs=in_specs,
        out_specs=pl.BlockSpec((block_rows, LANE), lambda i: (i, 0)),
        compiler_params=pltpu.CompilerParams(
            dimension_semantics=("parallel",)),   # v7x: shard batch over 2 TCs
    )(x_pad, *flat_params)

    # Single fused slice (rows + lanes) inside the jitted function.
    return out_pad[:batch, :out_size]


def policy_network_forward(x, params, *, block_rows=4096):
    """x: [B, input_size] f32/bf16; params: dict w1..wN [in,out], b1..bN [1,out].

    Returns bf16 probabilities of shape [B, output_size].
    """
    B, in_size = x.shape
    n_layers = len(params) // 2
    out_size = params[f"w{n_layers}"].shape[1]

    flat = _pad_params_for_kernel(params, n_layers)
    tb, b_pad = _choose_batch_tile(B, block_rows)

    x_bf = x.astype(jnp.bfloat16)
    if b_pad == B:
        x_in = x_bf                                       # no pad pass needed
    else:
        x_in = jnp.zeros((b_pad, in_size), jnp.bfloat16).at[:B].set(x_bf)

    return _policy_forward_padded(
        x_in, flat, batch=B, out_size=out_size, block_rows=tb)


def init_params(key, input_size, hidden_sizes, output_size):
    """Deterministic synthetic init (nn.Linear-style bounds, stored transposed)."""
    sizes = [input_size] + list(hidden_sizes) + [output_size]
    params = {}
    for i, (fan_in, fan_out) in enumerate(zip(sizes[:-1], sizes[1:]), start=1):
        key, kw, kb = jax.random.split(key, 3)
        bound = 1.0 / jnp.sqrt(fan_in)
        params[f"w{i}"] = jax.random.uniform(
            kw, (fan_in, fan_out), jnp.float32, -bound, bound)
        params[f"b{i}"] = jax.random.uniform(
            kb, (1, fan_out), jnp.float32, -bound, bound)
    return params


def reference_forward(x, params):
    """Pure-JAX f32 reference for sanity checking."""
    n_layers = len(params) // 2
    h = x
    for li in range(1, n_layers):
        h = jnp.maximum(h @ params[f"w{li}"] + params[f"b{li}"], 0.0)
    logits = h @ params[f"w{n_layers}"] + params[f"b{n_layers}"]
    return jax.nn.softmax(logits, axis=-1)


if __name__ == "__main__":
    # network_config = {'input_size': 32, 'hidden_sizes': [64, 64],
    #                   'policy_output_size': 16}
    input_size = 32
    hidden_sizes = [64, 64]
    output_size = 16
    batch = 8

    key = jax.random.PRNGKey(0)
    key, kx = jax.random.split(key)
    x = jax.random.normal(kx, (batch, input_size), jnp.float32)
    params = init_params(key, input_size, hidden_sizes, output_size)

    out = policy_network_forward(x, params)
    out = jax.block_until_ready(out)
    ref = reference_forward(x, params)

    assert out.shape == (batch, output_size), out.shape
    out_f32 = out.astype(jnp.float32)
    # Exact in-kernel divide -> rows sum to 1 up to bf16 output rounding (~2e-3).
    assert jnp.allclose(jnp.sum(out_f32, axis=-1), 1.0, atol=5e-3), \
        jnp.sum(out_f32, axis=-1)
    # bf16 MXU inputs + bf16 output -> loosened tolerance vs the f32 reference.
    assert jnp.allclose(out_f32, ref, atol=2e-2, rtol=2e-2)

    print("KERNEL_OK")
</pallas_src>

<mosaic_0001>
module attributes {stable_mosaic.version = 11 : i64} {
  func.func @policy_mlp_kernel(%arg0: i32, %arg1: memref<16x32xbf16, #tpu.memory_space<vmem>>, %arg2: memref<32x128xbf16, #tpu.memory_space<vmem>>, %arg3: memref<1x128xf32, #tpu.memory_space<vmem>>, %arg4: memref<128x128xbf16, #tpu.memory_space<vmem>>, %arg5: memref<1x128xf32, #tpu.memory_space<vmem>>, %arg6: memref<128x128xbf16, #tpu.memory_space<vmem>>, %arg7: memref<1x128xf32, #tpu.memory_space<vmem>>, %arg8: memref<16x128xbf16, #tpu.memory_space<vmem>>) attributes {dimension_semantics = [#tpu.dimension_semantics<parallel>], iteration_bounds = array<i64: 1>, scalar_prefetch = 0 : i64, scratch_operands = 0 : i64, tpu.core_type = #tpu.core_type<tc>, window_params = [{transform_indices = @transform_0, window_bounds = array<i64: 16, 32>}, {pipeline_mode = #tpu.pipeline_mode<synchronous>, transform_indices = @transform_1, window_bounds = array<i64: 32, 128>}, {pipeline_mode = #tpu.pipeline_mode<synchronous>, transform_indices = @transform_2, window_bounds = array<i64: 1, 128>}, {pipeline_mode = #tpu.pipeline_mode<synchronous>, transform_indices = @transform_3, window_bounds = array<i64: 128, 128>}, {pipeline_mode = #tpu.pipeline_mode<synchronous>, transform_indices = @transform_4, window_bounds = array<i64: 1, 128>}, {pipeline_mode = #tpu.pipeline_mode<synchronous>, transform_indices = @transform_5, window_bounds = array<i64: 128, 128>}, {pipeline_mode = #tpu.pipeline_mode<synchronous>, transform_indices = @transform_6, window_bounds = array<i64: 1, 128>}, {transform_indices = @transform_7, window_bounds = array<i64: 16, 128>}]} {
    %c0 = arith.constant 0 : index
    %c0_0 = arith.constant 0 : index
    %0 = vector.load %arg1[%c0, %c0_0] : memref<16x32xbf16, #tpu.memory_space<vmem>>, vector<16x32xbf16>
    %c0_1 = arith.constant 0 : index
    %c0_2 = arith.constant 0 : index
    %1 = vector.load %arg2[%c0_1, %c0_2] : memref<32x128xbf16, #tpu.memory_space<vmem>>, vector<32x128xbf16>
    %c0_3 = arith.constant 0 : index
    %c0_4 = arith.constant 0 : index
    %2 = vector.load %arg3[%c0_3, %c0_4] : memref<1x128xf32, #tpu.memory_space<vmem>>, vector<1x128xf32>
    %cst = arith.constant dense<0.000000e+00> : vector<16x128xf32>
    %3 = tpu.matmul %0, %1, %cst {dimension_numbers = #tpu.dot_dimension_numbers<[1], [0], [0], [1], [0, 0, 1, 1], [], []>} : vector<16x32xbf16>, vector<32x128xbf16>, vector<16x128xf32> -> vector<16x128xf32>
    %4 = vector.broadcast %2 : vector<1x128xf32> to vector<16x128xf32>
    %5 = arith.addf %3, %4 : vector<16x128xf32>
    %cst_5 = arith.constant 0.000000e+00 : f32
    %6 = vector.broadcast %cst_5 : f32 to vector<16x128xf32>
    %7 = arith.maximumf %5, %6 : vector<16x128xf32>
    %8 = arith.truncf %7 : vector<16x128xf32> to vector<16x128xbf16>
    %c0_6 = arith.constant 0 : index
    %c0_7 = arith.constant 0 : index
    %9 = vector.load %arg4[%c0_6, %c0_7] : memref<128x128xbf16, #tpu.memory_space<vmem>>, vector<128x128xbf16>
    %c0_8 = arith.constant 0 : index
    %c0_9 = arith.constant 0 : index
    %10 = vector.load %arg5[%c0_8, %c0_9] : memref<1x128xf32, #tpu.memory_space<vmem>>, vector<1x128xf32>
    %cst_10 = arith.constant dense<0.000000e+00> : vector<16x128xf32>
    %11 = tpu.matmul %8, %9, %cst_10 {dimension_numbers = #tpu.dot_dimension_numbers<[1], [0], [0], [1], [0, 0, 1, 1], [], []>} : vector<16x128xbf16>, vector<128x128xbf16>, vector<16x128xf32> -> vector<16x128xf32>
    %12 = vector.broadcast %10 : vector<1x128xf32> to vector<16x128xf32>
    %13 = arith.addf %11, %12 : vector<16x128xf32>
    %cst_11 = arith.constant 0.000000e+00 : f32
    %14 = vector.broadcast %cst_11 : f32 to vector<16x128xf32>
    %15 = arith.maximumf %13, %14 : vector<16x128xf32>
    %16 = arith.truncf %15 : vector<16x128xf32> to vector<16x128xbf16>
    %c0_12 = arith.constant 0 : index
    %c0_13 = arith.constant 0 : index
    %17 = vector.load %arg6[%c0_12, %c0_13] : memref<128x128xbf16, #tpu.memory_space<vmem>>, vector<128x128xbf16>
    %c0_14 = arith.constant 0 : index
    %c0_15 = arith.constant 0 : index
    %18 = vector.load %arg7[%c0_14, %c0_15] : memref<1x128xf32, #tpu.memory_space<vmem>>, vector<1x128xf32>
    %cst_16 = arith.constant dense<0.000000e+00> : vector<16x128xf32>
    %19 = tpu.matmul %16, %17, %cst_16 {dimension_numbers = #tpu.dot_dimension_numbers<[1], [0], [0], [1], [0, 0, 1, 1], [], []>} : vector<16x128xbf16>, vector<128x128xbf16>, vector<16x128xf32> -> vector<16x128xf32>
    %20 = vector.broadcast %18 : vector<1x128xf32> to vector<16x128xf32>
    %21 = arith.addf %19, %20 : vector<16x128xf32>
    %cst_17 = arith.constant dense<0xFF800000> : vector<16xf32>
    %22 = vector.multi_reduction <maximumf>, %21, %cst_17 [1] : vector<16x128xf32> to vector<16xf32>
    %23 = vector.shape_cast %22 : vector<16xf32> to vector<16x1xf32>
    %24 = vector.broadcast %23 : vector<16x1xf32> to vector<16x128xf32>
    %25 = arith.subf %21, %24 : vector<16x128xf32>
    %26 = math.exp %25 : vector<16x128xf32>
    %cst_18 = arith.constant dense<0.000000e+00> : vector<16xf32>
    %27 = vector.multi_reduction <add>, %26, %cst_18 [1] : vector<16x128xf32> to vector<16xf32>
    %28 = vector.shape_cast %27 : vector<16xf32> to vector<16x1xf32>
    %29 = vector.broadcast %28 : vector<16x1xf32> to vector<16x128xf32>
    %30 = arith.divf %26, %29 : vector<16x128xf32>
    %31 = arith.truncf %30 : vector<16x128xf32> to vector<16x128xbf16>
    %c0_19 = arith.constant 0 : index
    %c0_20 = arith.constant 0 : index
    %32 = vector.load %arg8[%c0_19, %c0_20] : memref<16x128xbf16, #tpu.memory_space<vmem>>, vector<16x128xbf16>
    tpu.vector_store %arg8[%c0_19, %c0_20], %31 {strides = array<i32>} : memref<16x128xbf16, #tpu.memory_space<vmem>>, vector<16x128xbf16>,
    return
  }
  func.func @transform_0(%arg0: i32) -> (i32, i32) {
    %c0_i32 = arith.constant 0 : i32
    %c0_i32_0 = arith.constant 0 : i32
    return %arg0, %c0_i32 : i32, i32
  }
  func.func @transform_1(%arg0: i32) -> (i32, i32) {
    %c0_i32 = arith.constant 0 : i32
    %c0_i32_0 = arith.constant 0 : i32
    %c0_i32_1 = arith.constant 0 : i32
    return %c0_i32, %c0_i32_0 : i32, i32
  }
  func.func @transform_2(%arg0: i32) -> (i32, i32) {
    %c0_i32 = arith.constant 0 : i32
    %c0_i32_0 = arith.constant 0 : i32
    %c0_i32_1 = arith.constant 0 : i32
    return %c0_i32, %c0_i32_0 : i32, i32
  }
  func.func @transform_3(%arg0: i32) -> (i32, i32) {
    %c0_i32 = arith.constant 0 : i32
    %c0_i32_0 = arith.constant 0 : i32
    %c0_i32_1 = arith.constant 0 : i32
    return %c0_i32, %c0_i32_0 : i32, i32
  }
  func.func @transform_4(%arg0: i32) -> (i32, i32) {
    %c0_i32 = arith.constant 0 : i32
    %c0_i32_0 = arith.constant 0 : i32
    %c0_i32_1 = arith.constant 0 : i32
    return %c0_i32, %c0_i32_0 : i32, i32
  }
  func.func @transform_5(%arg0: i32) -> (i32, i32) {
    %c0_i32 = arith.constant 0 : i32
    %c0_i32_0 = arith.constant 0 : i32
    %c0_i32_1 = arith.constant 0 : i32
    return %c0_i32, %c0_i32_0 : i32, i32
  }
  func.func @transform_6(%arg0: i32) -> (i32, i32) {
    %c0_i32 = arith.constant 0 : i32
    %c0_i32_0 = arith.constant 0 : i32
    %c0_i32_1 = arith.constant 0 : i32
    return %c0_i32, %c0_i32_0 : i32, i32
  }
  func.func @transform_7(%arg0: i32) -> (i32, i32) {
    %c0_i32 = arith.constant 0 : i32
    %c0_i32_0 = arith.constant 0 : i32
    return %arg0, %c0_i32 : i32, i32
  }
}

</mosaic_0001>

<bundles_post_ra>
// kernel: _policy_forward_padded.1
= control target key start
LH: loop header
LB: loop body
LE: loop exit
PB: predicated region body
PF: predicated region fallthrough
CT: control target
= control target key end

     0   :  { %12 = vsyncpa [#allocation3], 0  ;;  %s810_s0 = inlined_call_operand.hbm [shape: bf16[16,32], index: 0, kind: input, shape index: {}]   ;;  %s811_s1 = inlined_call_operand.hbm [shape: bf16[32,128], index: 1, kind: input, shape index: {}]   ;;  %s812_s2 = inlined_call_operand.vmem [shape: f32[1,128], index: 2, kind: input, shape index: {}]   ;;  %s813_s3 = inlined_call_operand.hbm [shape: bf16[128,128], index: 3, kind: input, shape index: {}]   ;;  %s814_s4 = inlined_call_operand.vmem [shape: f32[1,128], index: 4, kind: input, shape index: {}]   ;;  %s815_s5 = inlined_call_operand.hbm [shape: bf16[128,128], index: 5, kind: input, shape index: {}]   ;;  %s816_s6 = inlined_call_operand.vmem [shape: f32[1,128], index: 6, kind: input, shape index: {}]   ;;  %s817_s7 = inlined_call_operand.vmem [shape: bf16[16,128], index: 7, kind: output, shape index: {}]  }
   0x1   :  { %13 = vsyncpa [#allocation5], 0 }
   0x2   :  { %14 = vsyncpa [#allocation8], 0  ;;  %s652_s24 = smov [#allocation4]   ;;  %s653_s26 = smov [#allocation2]  }
   0x3   :  { %s32_s25 = sshll.u32 %s652_s24, 4  ;;  %s20_s27 = sshll.u32 %s653_s26, 4  ;;  %s33_s25 = int_to_ptr.vmem [resolvable:$true] %s32_s25  ;;  %s700_s27 = int_to_ptr.vmem [resolvable:$true] %s20_s27 }
   0x4   :  { %s558_s30 = scalar_lea.hbm %s811_s1, 256 }
   0x5   :  { %p559_p0 = scmp.ne.s32.totalorder %s811_s1, %s558_s30  ;;  %p562_p1 = scmp.lt.u32.totalorder %s558_s30, %s811_s1 }
   0x7   :  { %p564_p2 = pnand %p562_p1, %p559_p0 }
   0x9   :  { %567 = shalt.err (!%p564_p2)
}
   0xa   :  { %s568_s12 = scalar_lea.vmem %s33_s25, 256  ;;  %p573_p4 = scmp.lt.s32.totalorder %s33_s25, %s33_s25 }
   0xb   :  { %p569_p3 = scmp.ne.s32.totalorder %s33_s25, %s568_s12  ;;  %p574_p5 = scmp.lt.s32.totalorder %s568_s12, %s568_s12 }
   0xd   :  { %p575_p6 = por %p574_p5, %p573_p4 }
   0xf   :  { %p576_p7 = pnand %p575_p6, %p569_p3 }
  0x11   :  { %579 = shalt.err (!%p576_p7)
}
  0x12   :  { %s654_s13 = smov 64   ;;  %s655_s14 = smov 4  }
  0x13   :  { %38 = dma.hbm_to_vmem [thread:$0]  %s811_s1, 256, %s33_s25, [#allocation5], %s654_s13, %s654_s13, %s655_s14  }
  0x14   :  { %s580_s19 = scalar_lea.hbm %s810_s0, 128 }
  0x15   :  { %p581_p8 = scmp.ne.s32.totalorder %s810_s0, %s580_s19  ;;  %p584_p9 = scmp.lt.u32.totalorder %s580_s19, %s810_s0 }
  0x17   :  { %p586_p10 = pnand %p584_p9, %p581_p8 }
  0x19   :  { %589 = shalt.err (!%p586_p10)
}
  0x1a   :  { %s590_s24 = scalar_lea.vmem %s700_s27, 128  ;;  %p595_p12 = scmp.lt.s32.totalorder %s700_s27, %s700_s27 }
  0x1b   :  { %p591_p11 = scmp.ne.s32.totalorder %s700_s27, %s590_s24  ;;  %p596_p13 = scmp.lt.s32.totalorder %s590_s24, %s590_s24 }
  0x1d   :  { %p597_p0 = por %p596_p13, %p595_p12 }
  0x1f   :  { %p598_p1 = pnand %p597_p0, %p591_p11 }
  0x21   :  { %601 = shalt.err (!%p598_p1)
}
  0x22   :  { %26 = dma.hbm_to_vmem [thread:$0]  %s810_s0, 128, %s700_s27, [#allocation3], %s654_s13, %s654_s13, %s655_s14  }
  0x23   :  { %s656_s26 = smov [#allocation6]   ;;  %s657_s29 = smov [#allocation7]  }
  0x24   :  { %s46_s28 = sshll.u32 %s656_s26, 4  ;;  %s60_s30 = sshll.u32 %s657_s29, 4  ;;  %s47_s28 = int_to_ptr.vmem [resolvable:$true] %s46_s28  ;;  %s737_s30 = int_to_ptr.vmem [resolvable:$true] %s60_s30 }
  0x25   :  { %s602_s10 = scalar_lea.hbm %s813_s3, 1024 }
  0x26   :  { %p603_p2 = scmp.ne.s32.totalorder %s813_s3, %s602_s10  ;;  %p606_p3 = scmp.lt.u32.totalorder %s602_s10, %s813_s3 }
  0x28   :  { %p608_p4 = pnand %p606_p3, %p603_p2 }
  0x2a   :  { %611 = shalt.err (!%p608_p4)
}
  0x2b   :  { %s612_s0 = scalar_lea.vmem %s47_s28, 1024  ;;  %p617_p6 = scmp.lt.s32.totalorder %s47_s28, %s47_s28 }
  0x2c   :  { %p613_p5 = scmp.ne.s32.totalorder %s47_s28, %s612_s0  ;;  %p618_p7 = scmp.lt.s32.totalorder %s612_s0, %s612_s0 }
  0x2e   :  { %p619_p8 = por %p618_p7, %p617_p6 }
  0x30   :  { %p620_p9 = pnand %p619_p8, %p613_p5 }
  0x32   :  { %623 = shalt.err (!%p620_p9)
}
  0x33   :  { %52 = dma.hbm_to_vmem [thread:$0]  %s813_s3, 1024, %s47_s28, [#allocation5], %s654_s13, %s654_s13, %s655_s14  }
  0x34   :  { %s624_s20 = scalar_lea.hbm %s815_s5, 1024 }
  0x35   :  { %p625_p10 = scmp.ne.s32.totalorder %s815_s5, %s624_s20  ;;  %p628_p11 = scmp.lt.u32.totalorder %s624_s20, %s815_s5 }
  0x37   :  { %p630_p12 = pnand %p628_p11, %p625_p10 }
  0x39   :  { %633 = shalt.err (!%p630_p12)
}
  0x3a   :  { %s634_s1 = scalar_lea.vmem %s737_s30, 1024  ;;  %p639_p0 = scmp.lt.s32.totalorder %s737_s30, %s737_s30 }
  0x3b   :  { %p635_p13 = scmp.ne.s32.totalorder %s737_s30, %s634_s1  ;;  %p640_p1 = scmp.lt.s32.totalorder %s634_s1, %s634_s1 }
  0x3d   :  { %p641_p2 = por %p640_p1, %p639_p0 }
  0x3f   :  { %p642_p3 = pnand %p641_p2, %p635_p13 }
  0x41   :  { %645 = shalt.err (!%p642_p3)
}
  0x42   :  { %66 = dma.hbm_to_vmem [thread:$0]  %s815_s5, 1024, %s737_s30, [#allocation8], %s654_s13, %s654_s13, %s655_s14  }
  0x43   :  { %646 = dma.done.wait [#allocation3], 128  }
  0x44   :  { %647 = vsyncadd [#allocation3], 4294967168 }
  0x45   :  { %648 = dma.done.wait [#allocation5], 1280  }
  0x46   :  { %649 = vsyncadd [#allocation5], 4294966016 }
  0x47   :  { %650 = dma.done.wait [#allocation8], 1024  }
  0x48   :  { %651 = vsyncadd [#allocation8], 4294966272  ;;  %v658_v0 = vmov 0.0   ;;  %vm659_vm0 = vmmov 0   ;;  %v531_v1 = vld [vmem:[#allocation4] sm:$0xff]   ;;  %v532_v2 = vld [vmem:[#allocation4 + $0x8] sm:$0xff]  }
  0x49   :  { %475 = vmatprep.subr.bf16.mxu0 %v658_v0  ;;  %479 = vmatprep.mubr.msk.bf16.mxu0 %vm659_vm0, %v658_v0  ;;  %v534_v3 = vld [vmem:[#allocation6] sm:$0xff]   ;;  %v533_v4 = vld [vmem:[#allocation2] sm:$0xff]   ;;  %vm112_vm1 = vcmask 261120   ;;  %v536_v6 = vld [vmem:[#allocation6 + $0x10] sm:$0xff]  }
  0x4a   :  { %483 = vmatprep.subr.bf16.mxu1 %v658_v0  ;;  %499 = vmatprep.mubr.msk.bf16.mxu1 %vm659_vm0, %v658_v0  ;;  %v535_v5 = vld [vmem:[#allocation6 + $0x8] sm:$0xff]   ;;  %v537_v7 = vld [vmem:[#allocation6 + $0x18] sm:$0xff]   ;;  %v538_v8 = vld [vmem:[#allocation6 + $0x20] sm:$0xff]  }
  0x4b   :  { %476 = vmatpush3.bf16.msra.mxu0 %v531_v1  ;;  %484 = vmatpush3.bf16.msra.mxu1 %v534_v3  ;;  %v539_v9 = vld [vmem:[#allocation6 + $0x28] sm:$0xff]   ;;  %v540_v10 = vld [vmem:[#allocation6 + $0x30] sm:$0xff]   ;;  %v541_v11 = vld [vmem:[#allocation6 + $0x38] sm:$0xff]  }
  0x4c   :  { %477 = vmatprep.subr.bf16.mxu0 %v658_v0  ;;  %485 = vmatprep.subr.bf16.mxu1 %v658_v0  ;;  %v542_v12 = vld [vmem:[#allocation7] sm:$0xff]   ;;  %v543_v13 = vld [vmem:[#allocation7 + $0x8] sm:$0xff]   ;;  %v544_v14 = vld [vmem:[#allocation7 + $0x10] sm:$0xff]  }
  0x4d   :  { %v545_v15 = vld [vmem:[#allocation7 + $0x18] sm:$0xff]   ;;  %v546_v16 = vld [vmem:[#allocation7 + $0x20] sm:$0xff]   ;;  %v547_v17 = vld [vmem:[#allocation7 + $0x28] sm:$0xff]  }
  0x4e   :  { %v422_v18 = vld [vmem:[%s812_s2] ss:$0 sm:$0xff]  ;;  %v548_v28 = vld [vmem:[#allocation7 + $0x30] sm:$0xff]   ;;  %v549_v29 = vld [vmem:[#allocation7 + $0x38] sm:$0xff]  }
  0x4f   :  { %478 = vmatpush3.bf16.msra.mxu0 %v532_v2  ;;  %486 = vmatpush3.bf16.msra.mxu1 %v535_v5  ;;  %v427_v30 = vld [vmem:[%s814_s4] ss:$0 sm:$0xff] }
  0x50   :  { %503 = vmatprep.subr.bf16.mxu0 %v658_v0  ;;  %487 = vmatprep.subr.bf16.mxu1 %v658_v0  ;;  %v436_v40 = vld [vmem:[%s816_s6] ss:$0 sm:$0xff] }
  0x52   :  { %480 = vmatmul.mubr.msk.bf16.vlgmr.msra.gmra.mrb[0].mxu0 %vm112_vm1, %v533_v4 }
  0x53   :  { %519 = vmatprep.mubr.msk.bf16.mxu0 %vm659_vm0, %v658_v0  ;;  %488 = vmatpush3.bf16.msra.mxu1 %v536_v6 }
  0x54   :  { %489 = vmatprep.subr.bf16.mxu1 %v658_v0  ;;  %504 = vmatpush3.bf16.msra.mxu0 %v542_v12 }
  0x55   :  { %505 = vmatprep.subr.bf16.mxu0 %v658_v0 }
  0x57   :  { %490 = vmatpush3.bf16.msra.mxu1 %v537_v7 }
  0x58   :  { %491 = vmatprep.subr.bf16.mxu1 %v658_v0  ;;  %506 = vmatpush3.bf16.msra.mxu0 %v543_v13 }
  0x59   :  { %507 = vmatprep.subr.bf16.mxu0 %v658_v0 }
  0x5b   :  { %492 = vmatpush3.bf16.msra.mxu1 %v538_v8 }
  0x5c   :  { %493 = vmatprep.subr.bf16.mxu1 %v658_v0  ;;  %508 = vmatpush3.bf16.msra.mxu0 %v544_v14 }
  0x5d   :  { %509 = vmatprep.subr.bf16.mxu0 %v658_v0 }
  0x5f   :  { %494 = vmatpush3.bf16.msra.mxu1 %v539_v9 }
  0x60   :  { %495 = vmatprep.subr.bf16.mxu1 %v658_v0  ;;  %510 = vmatpush3.bf16.msra.mxu0 %v545_v15 }
  0x61   :  { %511 = vmatprep.subr.bf16.mxu0 %v658_v0 }
  0x63   :  { %496 = vmatpush3.bf16.msra.mxu1 %v540_v10 }
  0x64   :  { %497 = vmatprep.subr.bf16.mxu1 %v658_v0  ;;  %512 = vmatpush3.bf16.msra.mxu0 %v546_v16 }
  0x65   :  { %513 = vmatprep.subr.bf16.mxu0 %v658_v0 }
  0x67   :  { %498 = vmatpush3.bf16.msra.mxu1 %v541_v11 }
  0x68   :  { %514 = vmatpush3.bf16.msra.mxu0 %v547_v17 }
  0x69   :  { %515 = vmatprep.subr.bf16.mxu0 %v658_v0 }
  0x6c   :  { %516 = vmatpush3.bf16.msra.mxu0 %v548_v28 }
  0x6d   :  { %517 = vmatprep.subr.bf16.mxu0 %v658_v0 }
  0x70   :  { %518 = vmatpush3.bf16.msra.mxu0 %v549_v29 }
 0x125   :  { %v150_v19 = vpop.f32.mrb[0].mxu0 }
 0x126   :  { %v151_v20 = vadd.f32 %v422_v18, %v150_v19  ;;  %v481_v21 = vpop.f32.mrb[1].mxu0 }
 0x127   :  { %v153_v22 = vpop.f32.mrb[2].mxu0 }
 0x128   :  { %v154_v23 = vadd.f32 %v422_v18, %v153_v22  ;;  %v482_v24 = vpop.f32.mrb[3].mxu0  ;;  %v157_v25 = vmax.f32 %v151_v20, 0.0 }
 0x12a   :  { %v158_v26 = vmax.f32 %v154_v23, 0.0 }
 0x12c   :  { %v159_v27 = vpack.c.bf16 %v158_v26, %v157_v25 }
 0x12e   :  { %500 = vmatmul.mubr.bf16.vlgmr.msra.gmra.mrb[0].mxu1 %v159_v27 }
 0x201   :  { %v265_v31 = vpop.f32.mrb[0].mxu1 }
 0x202   :  { %v266_v32 = vadd.f32 %v427_v30, %v265_v31  ;;  %v501_v33 = vpop.f32.mrb[1].mxu1 }
 0x203   :  { %v268_v34 = vpop.f32.mrb[2].mxu1 }
 0x204   :  { %v269_v35 = vadd.f32 %v427_v30, %v268_v34  ;;  %v502_v36 = vpop.f32.mrb[3].mxu1  ;;  %v272_v37 = vmax.f32 %v266_v32, 0.0 }
 0x206   :  { %v273_v38 = vmax.f32 %v269_v35, 0.0 }
 0x208   :  { %v274_v39 = vpack.c.bf16 %v273_v38, %v272_v37 }
 0x20a   :  { %520 = vmatmul.mubr.bf16.vlgmr.msra.gmra.mrb[4].mxu0 %v274_v39 }
 0x2dd   :  { %v380_v41 = vpop.f32.mrb[4].mxu0 }
 0x2de   :  { %v381_v42 = vadd.f32 %v436_v40, %v380_v41  ;;  %v521_v43 = vpop.f32.mrb[5].mxu0 }
 0x2df   :  { %v383_v44 = vpop.f32.mrb[6].mxu0 }
 0x2e0   :  { %387 = vmax.xlane.f32.xlu0 %v381_v42  ;;  %v522_v45 = vpop.f32.mrb[7].mxu0  ;;  %v384_v46 = vadd.f32 %v436_v40, %v383_v44 }
 0x2e4   :  { %389 = vmax.xlane.f32.xlu0 %v384_v46 }
 0x36d   :  { %v388_v47 = vpop.xlane.xlu0 %387 }
 0x36e   :  { %v391_v48 = vsub.f32 %v381_v42, %v388_v47 }
 0x370   :  { %v393_v49 = vmul.f32 1.442695, %v391_v48 }
 0x371   :  { %v390_v50 = vpop.xlane.xlu0 %389 }
 0x372   :  { %550 = vpow2.f32 %v393_v49  ;;  %v392_v51 = vsub.f32 %v384_v46, %v390_v50 }
 0x374   :  { %v395_v52 = vmul.f32 1.442695, %v392_v51 }
 0x376   :  { %552 = vpow2.f32 %v395_v52 }
 0x37c   :  { %v551_v53 = vpop.eup %550 }
 0x37d   :  { %397 = vadd.xlane.f32.xlu1 %v551_v53 }
 0x380   :  { %v553_v54 = vpop.eup %552 }
 0x381   :  { %399 = vadd.xlane.f32.xlu1 %v553_v54 }
 0x40a   :  { %v398_v55 = vpop.xlane.xlu1 %397 }
 0x40b   :  { %554 = vrcp.f32 %v398_v55 }
 0x40e   :  { %v400_v56 = vpop.xlane.xlu1 %399 }
 0x40f   :  { %556 = vrcp.f32 %v400_v56 }
 0x415   :  { %v555_v57 = vpop.eup %554 }
 0x416   :  { %v402_v59 = vmul.f32 %v555_v57, %v551_v53 }
 0x419   :  { %v557_v58 = vpop.eup %556 }
 0x41a   :  { %v404_v60 = vmul.f32 %v557_v58, %v553_v54 }
 0x41c   :  { %v452_v61 = vpack.c.bf16 %v404_v60, %v402_v59 }
 0x41e   :  { %453 = vst [vmem:[%s817_s7] sm:$0xff] %v452_v61  }
 0x41f   :  { %419 = vsyncpa [#allocation3], 1 }
 0x420   :  { %420 = vsyncpa [#allocation5], 1 }
 0x421   :  { %421 = vsyncpa [#allocation8], 1 }

</bundles_post_ra>
